<compile_context>
chip_gen: v6e
topology: v6e:2x2x1
jax: 0.10.0
libtpu: 0.0.40
codegen_flags: <defaults>
</compile_context>

<pallas_src>
import jax
import jax.numpy as jnp
from jax.experimental import pallas as pl
from jax.experimental.pallas import tpu as pltpu


def se_block_kernel(x_ref, w1_ref, w2_ref, o_ref):
    # x_ref / o_ref : (C, HW)  -- batch dim squeezed away by the BlockSpec
    # w1_ref        : (C_r, C) -- fc1 weight (out, in), PyTorch Linear layout
    # w2_ref        : (C, C_r) -- fc2 weight (out, in)
    x = x_ref[...]
    hw = x.shape[-1]
    xf = x.astype(jnp.float32)                       # f32 math even for bf16 I/O

    # squeeze: global average pool over the spatial (lane) axis -> (C, 1)
    pooled = jnp.sum(xf, axis=-1, keepdims=True) * (1.0 / hw)

    # excitation, column-vector form (layout-consistent with the (C, HW) tile,
    # so the gate broadcast below needs no transpose / XLU work)
    h = jnp.dot(w1_ref[...].astype(jnp.float32), pooled,
                preferred_element_type=jnp.float32)          # (C_r, 1)
    h = jnp.maximum(h, 0.0)
    s = jnp.dot(w2_ref[...].astype(jnp.float32), h,
                preferred_element_type=jnp.float32)          # (C, 1)
    s = jax.nn.sigmoid(s)

    # scale: broadcast the per-channel gate over the lane (spatial) axis
    o_ref[...] = (xf * s).astype(o_ref.dtype)


def se_block_pallas(x_nchw, w1, w2):
    """x_nchw: (B, C, H, W); w1: (C//ratio, C); w2: (C, C//ratio).

    Output dtype == x dtype.  Pass bf16 x for a ~2x HBM-bandwidth win; the
    pool / excitation math stays in f32 inside the kernel.
    """
    B, C, H, W = x_nchw.shape
    HW = H * W
    C_r = w1.shape[0]

    x = x_nchw.reshape(B, C, HW)

    # ---- explicit VMEM budget (kernel is HBM-bound; capacity is the risk) ----
    x_item = jnp.dtype(x.dtype).itemsize
    w_item = jnp.dtype(w1.dtype).itemsize
    tile_bytes = C * HW * x_item                      # one (C, HW) tile
    w_bytes = (w1.size + w2.size) * w_item
    # The pipeline keeps the input AND output tiles double-buffered (4x tile)
    # plus the (double-buffered) weights.
    vmem_needed = 4 * tile_bytes + 2 * w_bytes
    # v7x has only 64 MiB physical VMEM per TensorCore; keep headroom.  For
    # shapes beyond this, switch x to memory_space=pl.ANY and hand-roll a
    # single in-place VMEM buffer (DMA in, scale, DMA the same buffer out).
    assert vmem_needed <= (48 << 20), (
        f"SE tile C={C}, HW={HW} ({x.dtype}) needs ~{vmem_needed >> 20} MiB of "
        "pipelined VMEM; use a manual-DMA in-place variant for this shape.")
    vmem_limit = min(max(int(1.5 * vmem_needed) + (4 << 20), 32 << 20), 128 << 20)

    out = pl.pallas_call(
        se_block_kernel,
        out_shape=jax.ShapeDtypeStruct((B, C, HW), x.dtype),
        grid_spec=pltpu.PrefetchScalarGridSpec(
            num_scalar_prefetch=0,
            # One batch element per grid step.  With 'parallel' semantics the
            # batch axis is sharded across v7x's two TensorCores (needs B >= 2
            # for full utilization; v5e/v6e are single-TC so it is moot there).
            grid=(B,),
            in_specs=[
                # Squeeze the batch dim: the kernel sees a 2-D (C, HW) tile
                # with C on sublanes and the full, lane-dense HW on lanes.
                pl.BlockSpec((pl.Squeezed(), C, HW), lambda b: (b, 0, 0)),
                # Weight blocks are constant across the grid.  (For very large
                # C one could add pipeline_mode=pl.Buffered(1) to drop their
                # second VMEM buffer; at realistic SE sizes it is noise.)
                pl.BlockSpec((C_r, C), lambda b: (0, 0)),
                pl.BlockSpec((C, C_r), lambda b: (0, 0)),
            ],
            out_specs=pl.BlockSpec((pl.Squeezed(), C, HW), lambda b: (b, 0, 0)),
        ),
        # Output is just x scaled per block -> let the HBM output buffer alias x.
        input_output_aliases={0: 0},
        compiler_params=pltpu.CompilerParams(
            dimension_semantics=("parallel",),
            vmem_limit_bytes=vmem_limit,
        ),
    )(x, w1, w2)

    return out.reshape(B, C, H, W)


def se_block_ref(x_nchw, w1, w2):
    """Pure-JAX reference matching the PyTorch forward (f32 math)."""
    xf = x_nchw.astype(jnp.float32)
    pooled = jnp.mean(xf, axis=(2, 3))                   # (B, C)
    h = jnp.maximum(pooled @ w1.T, 0.0)                  # (B, C_r)
    s = jax.nn.sigmoid(h @ w2.T)                         # (B, C)
    return xf * s[:, :, None, None]


if __name__ == "__main__":
    # Shapes implied by the module: NCHW input, in_channel=C, ratio=4.
    B, C, H, W = 2, 4, 16, 16
    ratio = 4
    C_r = C // ratio

    key = jax.random.PRNGKey(0)
    kx, k1, k2 = jax.random.split(key, 3)

    x = jax.random.normal(kx, (B, C, H, W), dtype=jnp.float32)

    # Deterministic Linear-style init (uniform in +/- 1/sqrt(fan_in)), no bias.
    bound1 = 1.0 / (C ** 0.5)
    bound2 = 1.0 / (C_r ** 0.5)
    w1 = jax.random.uniform(k1, (C_r, C), jnp.float32, -bound1, bound1)   # fc1.weight
    w2 = jax.random.uniform(k2, (C, C_r), jnp.float32, -bound2, bound2)   # fc2.weight

    ref = se_block_ref(x, w1, w2)

    # f32 path
    out = jax.block_until_ready(se_block_pallas(x, w1, w2))
    assert out.shape == (B, C, H, W)
    assert jnp.allclose(out, ref, atol=1e-5, rtol=1e-5), "f32 mismatch vs reference"

    # bf16 I/O path (HBM-bound kernel -> ~2x bandwidth win; f32 math inside).
    out_bf16 = jax.block_until_ready(se_block_pallas(x.astype(jnp.bfloat16), w1, w2))
    assert out_bf16.dtype == jnp.bfloat16
    assert jnp.allclose(out_bf16.astype(jnp.float32), ref, atol=5e-2, rtol=5e-2), \
        "bf16 mismatch vs reference"

    print("KERNEL_OK")
</pallas_src>

<mosaic_0001>
module attributes {stable_mosaic.version = 11 : i64} {
  func.func @se_block_kernel(%arg0: i32, %arg1: memref<1x4x256xf32, #tpu.memory_space<vmem>>, %arg2: memref<1x4xf32, #tpu.memory_space<vmem>>, %arg3: memref<4x1xf32, #tpu.memory_space<vmem>>, %arg4: memref<1x4x256xf32, #tpu.memory_space<vmem>>) attributes {dimension_semantics = [#tpu.dimension_semantics<parallel>], iteration_bounds = array<i64: 2>, scalar_prefetch = 0 : i64, scratch_operands = 0 : i64, tpu.core_type = #tpu.core_type<tc>, window_params = [{transform_indices = @transform_0, window_bounds = array<i64: 1, 4, 256>}, {pipeline_mode = #tpu.pipeline_mode<synchronous>, transform_indices = @transform_1, window_bounds = array<i64: 1, 4>}, {pipeline_mode = #tpu.pipeline_mode<synchronous>, transform_indices = @transform_2, window_bounds = array<i64: 4, 1>}, {transform_indices = @transform_3, window_bounds = array<i64: 1, 4, 256>}]} {
    %c0 = arith.constant 0 : index
    %c0_0 = arith.constant 0 : index
    %c0_1 = arith.constant 0 : index
    %0 = vector.load %arg1[%c0, %c0_0, %c0_1] : memref<1x4x256xf32, #tpu.memory_space<vmem>>, vector<1x4x256xf32>
    %1 = vector.shape_cast %0 : vector<1x4x256xf32> to vector<4x256xf32>
    %cst = arith.constant dense<0.000000e+00> : vector<4xf32>
    %2 = vector.multi_reduction <add>, %1, %cst [1] : vector<4x256xf32> to vector<4xf32>
    %3 = vector.shape_cast %2 : vector<4xf32> to vector<4x1xf32>
    %cst_2 = arith.constant 3.906250e-03 : f32
    %4 = vector.broadcast %cst_2 : f32 to vector<4x1xf32>
    %5 = arith.mulf %3, %4 : vector<4x1xf32>
    %c0_3 = arith.constant 0 : index
    %c0_4 = arith.constant 0 : index
    %6 = vector.load %arg2[%c0_3, %c0_4] : memref<1x4xf32, #tpu.memory_space<vmem>>, vector<1x4xf32>
    %cst_5 = arith.constant dense<0.000000e+00> : vector<1x1xf32>
    %7 = tpu.matmul %6, %5, %cst_5 {dimension_numbers = #tpu.dot_dimension_numbers<[1], [0], [0], [1], [0, 0, 1, 1], [], []>} : vector<1x4xf32>, vector<4x1xf32>, vector<1x1xf32> -> vector<1x1xf32>
    %cst_6 = arith.constant 0.000000e+00 : f32
    %8 = vector.broadcast %cst_6 : f32 to vector<1x1xf32>
    %9 = arith.maximumf %7, %8 : vector<1x1xf32>
    %c0_7 = arith.constant 0 : index
    %c0_8 = arith.constant 0 : index
    %10 = vector.load %arg3[%c0_7, %c0_8] : memref<4x1xf32, #tpu.memory_space<vmem>>, vector<4x1xf32>
    %cst_9 = arith.constant dense<0.000000e+00> : vector<4x1xf32>
    %11 = tpu.matmul %10, %9, %cst_9 {dimension_numbers = #tpu.dot_dimension_numbers<[1], [0], [0], [1], [0, 0, 1, 1], [], []>} : vector<4x1xf32>, vector<1x1xf32>, vector<4x1xf32> -> vector<4x1xf32>
    %12 = arith.negf %11 : vector<4x1xf32>
    %13 = math.exp %12 : vector<4x1xf32>
    %cst_10 = arith.constant 1.000000e+00 : f32
    %14 = vector.broadcast %cst_10 : f32 to vector<4x1xf32>
    %15 = arith.addf %14, %13 : vector<4x1xf32>
    %16 = arith.divf %14, %15 : vector<4x1xf32>
    %17 = vector.broadcast %16 : vector<4x1xf32> to vector<4x256xf32>
    %18 = arith.mulf %1, %17 : vector<4x256xf32>
    %c0_11 = arith.constant 0 : index
    %c0_12 = arith.constant 0 : index
    %c0_13 = arith.constant 0 : index
    %19 = vector.load %arg4[%c0_11, %c0_12, %c0_13] : memref<1x4x256xf32, #tpu.memory_space<vmem>>, vector<1x4x256xf32>
    %20 = vector.shape_cast %19 : vector<1x4x256xf32> to vector<4x256xf32>
    %21 = vector.shape_cast %18 : vector<4x256xf32> to vector<1x4x256xf32>
    tpu.vector_store %arg4[%c0_11, %c0_12, %c0_13], %21 {strides = array<i32>} : memref<1x4x256xf32, #tpu.memory_space<vmem>>, vector<1x4x256xf32>,
    return
  }
  func.func @transform_0(%arg0: i32) -> (i32, i32, i32) {
    %c0_i32 = arith.constant 0 : i32
    %c0_i32_0 = arith.constant 0 : i32
    %c0_i32_1 = arith.constant 0 : i32
    return %arg0, %c0_i32, %c0_i32_0 : i32, i32, i32
  }
  func.func @transform_1(%arg0: i32) -> (i32, i32) {
    %c0_i32 = arith.constant 0 : i32
    %c0_i32_0 = arith.constant 0 : i32
    %c0_i32_1 = arith.constant 0 : i32
    return %c0_i32, %c0_i32_0 : i32, i32
  }
  func.func @transform_2(%arg0: i32) -> (i32, i32) {
    %c0_i32 = arith.constant 0 : i32
    %c0_i32_0 = arith.constant 0 : i32
    %c0_i32_1 = arith.constant 0 : i32
    return %c0_i32, %c0_i32_0 : i32, i32
  }
  func.func @transform_3(%arg0: i32) -> (i32, i32, i32) {
    %c0_i32 = arith.constant 0 : i32
    %c0_i32_0 = arith.constant 0 : i32
    %c0_i32_1 = arith.constant 0 : i32
    return %arg0, %c0_i32, %c0_i32_0 : i32, i32, i32
  }
}

</mosaic_0001>

<bundles_post_ra>
// kernel: tpu_custom_call.1
= control target key start
LH: loop header
LB: loop body
LE: loop exit
PB: predicated region body
PF: predicated region fallthrough
CT: control target
= control target key end

     0   :  { %8 = vsyncpa [#allocation3], 0  ;;  %s826_s0 = inlined_call_operand.hbm [shape: f32[2,4,256], index: 0, kind: input, shape index: {}, may-alias: {0,3}]   ;;  %s827_s1 = inlined_call_operand.vmem [shape: f32[1,4], index: 1, kind: input, shape index: {}]   ;;  %s828_s2 = inlined_call_operand.vmem [shape: f32[4,1], index: 2, kind: input, shape index: {}]   ;;  %s829_s3 = inlined_call_operand.hbm [shape: f32[2,4,256], index: 3, kind: output, shape index: {}, may-alias: {0,3}]  }
   0x1   :  { %10 = vsyncpa [#allocation3 + $0x1], 0 }
   0x2   :  { %11 = vsyncpa [#allocation4], 0 }
   0x3   :  { %13 = vsyncpa [#allocation4 + $0x1], 0  ;;  %s672_s12 = smov 0   ;;  %s674_s13 = smov 0  }
   0x4   :  { %s676_s14 = smov 0   ;;  %s678_s15 = smov 0  }
   0x5 LB: > { %s693_s16 = sadd.s32 4294967295, %s644_s15   ;;  %s461_s17 = sadd.s32 4294967294, %s644_s15   ;;  %s644_s15 = sphi %s678_s15, %s846_s15   ;;  %s640_s14 = sphi %s676_s14, %s845_s14   ;;  %s636_s13 = sphi %s674_s13, %s844_s13   ;;  %s632_s12 = sphi %s672_s12, %s843_s12  }
   0x6   : > { %s697_s18 = sadd.s32 1, %s644_s15   ;;  %s26_s19 = sadd.s32 1, %s640_s14 }
   0x7   : > { %s23_s20 = ssub.s32 %s644_s15, %s697_s18  ;;  %p33_p0 = scmp.ne.s32.totalorder %s640_s14, %s636_s13 }
   0x8   : > { %p24_p1 = scmp.eq.s32.totalorder %s23_s20, 0  ;;  %p34_p2 = scmp.eq.s32.totalorder %s644_s15, 0 }
   0x9   : > { %p39_p3 = scmp.ne.s32.totalorder %s636_s13, %s632_s12  ;;  %p40_p4 = scmp.eq.s32.totalorder %s693_s16, 0 }
   0xa   : > { %s709_s21 = scalar_select %p24_p1, %s640_s14, %s26_s19  }
   0xb   : > { %p711_p5 = por %p34_p2, %p33_p0  ;;  %p715_p6 = por %p40_p4, %p39_p3 }
   0xc   : > { %p105_p7 = scmp.eq.s32.totalorder %s693_s16, 1  ;;  %p111_p8 = scmp.eq.s32.totalorder %s461_s17, 1 }
   0xd   : > { %s833_s23 = scalar_select %p715_p6, 1, 0 }
   0xe   : > { %p508_p10 = scmp.lt.s32.totalorder %s644_s15, 2  ;;  %p722_p11 = por %p105_p7, %p33_p0 }
   0xf   : > { %p726_p12 = por %p111_p8, %p39_p3  ;;  %s137_s26 = sand.u32 1, %s640_s14  }
  0x10   : > { %s834_s24 = scalar_select %p722_p11, 1, 0 }
  0x11   : > { %s835_s25 = scalar_select %p726_p12, 1, 0 }
  0x12   : > { %s480_s27 = sshll.u32 %s644_s15, 7  ;;  %s464_s28 = sshll.u32 %s137_s26, 3 }
  0x13   : > { %s735_s4 = scalar_lea.hbm %s826_s0, %s480_s27  ;;  %s141_s5 = scalar_lea.vmem [#allocation2], %s464_s28 }
  0x14   : > { %s149_s6 = sshll.u32 %s141_s5, 4  ;;  %p739_p13 = pnand %p508_p10, %p711_p5  ;;  %s743_s6 = int_to_ptr.vmem [resolvable:$true] %s149_s6 }
  0x15   : > { %s138_s8 = scalar_lea.sflag [#allocation3], %s137_s26  ;;  %s552_s9 = scalar_lea.hbm %s735_s4, 128 }
  0x16   : > { %p553_p2 = scmp.ne.s32.totalorder %s735_s4, %s552_s9  ;;  %p554_p3 = pneg %p739_p13 }
  0x17   : > { %s557_s17 = scalar_lea.hbm %s826_s0, 256  ;;  %p558_p5 = scmp.lt.s32.totalorder %s735_s4, %s826_s0 }
  0x18   : > { %p555_p4 = pnand %p554_p3, %p553_p2  ;;  %p559_p8 = scmp.lt.s32.totalorder %s557_s17, %s552_s9 }
  0x1a   : > { %p556_p7 = pneg %p555_p4  ;;  %p560_p10 = por %p559_p8, %p558_p5 }
  0x1c   : > { %p561_p9 = pnand %p560_p10, %p556_p7 }
  0x1e   : > { %564 = shalt.err (!%p561_p9)
}
  0x1f   : > { %s565_s22 = scalar_lea.vmem %s743_s6, 128  ;;  %s646_s26 = smov [#allocation2]  }
  0x20   : > { %p566_p0 = scmp.ne.s32.totalorder %s743_s6, %s565_s22  ;;  %s570_s27 = sshll.u32 %s646_s26, 4  ;;  %s571_s27 = int_to_ptr.vmem [resolvable:$false] %s570_s27 }
  0x21   : > { %s572_s28 = scalar_lea.vmem %s571_s27, 256  ;;  %p573_p4 = scmp.lt.s32.totalorder %s743_s6, %s571_s27 }
  0x22   : > { %p568_p1 = pnand %p566_p0, %p554_p3  ;;  %p574_p12 = scmp.lt.s32.totalorder %s572_s28, %s565_s22 }
  0x24   : > { %p569_p2 = pneg %p568_p1  ;;  %p575_p11 = por %p574_p12, %p573_p4 }
  0x26   : > { %p576_p6 = pnand %p575_p11, %p569_p2 }
  0x28   : > { %579 = shalt.err (!%p576_p6)
}
  0x29   : > { %503 = dma.hbm_to_vmem [thread:$0]  (!%p739_p13), %s735_s4, 128, %s743_s6, %s138_s8  }
  0x2a   : > { %p837_p9 = scmp.lt.s32.totalorder %s644_s15, 3  ;;  %p838_p7 = scmp.ge.s32.totalorder %s644_s15, 1 }
  0x2c   : > { %p155_p0 = pnand %p838_p7, %p837_p9 }
  0x2d   : > { %s770_s29 = sand.u32 (!%p155_p0), 1, %s636_s13   ;;  %p839_p6 = scmp.ne.s32.totalorder (!%p155_p0), %s833_s23, 0 }
  0x2e   : > { %158 = sbr.rel (%p155_p0) target bundleno = 761 (0x2f9), region = 32  ;;  %s468_s30 = sshll.u32 (!%p155_p0), %s770_s29, 3 }
  0x2f   : > { %s161_s5 = scalar_lea.sflag (!%p155_p0), [#allocation3], %s770_s29  ;;  %s164_s7 = scalar_lea.vmem (!%p155_p0), [#allocation2], %s468_s30 }
  0x33   : > { %623 = dma.done.wait (%p839_p6), %s161_s5, 128  }
  0x34   : > { %625 = vsyncadd (%p839_p6), %s161_s5, 4294967168  ;;  %vm191_vm0 = vcmask 1043456   ;;  %v187_v0 = vld [vmem:[%s164_s7] sm:$0xff]  ;;  %v647_v5 = vmov 0.0   ;;  %vm648_vm1 = vmmov 0   ;;  %vm199_vm2 = vcmask 31744  }
  0x35   : > { %v189_v1 = vcombine.high %v187_v0, %v187_v0  ;;  %v192_v2 = vsel %vm191_vm0, %v187_v0, 0.0  ;;  %486 = vmatprep.subr.mxu0 %v647_v5  ;;  %491 = vmatprep.subr.mxu1 %v647_v5  ;;  %v198_v8 = vld [vmem:[%s827_s1] sm:$0x1]  ;;  %vm282_vm3 = vcmask 1040384   ;;  %vm278_vm4 = vcmask 7168   ;;  %s481_s9 = sshll.u32 %s693_s16, 7 }
  0x36   : > { %488 = vmatprep.mubr.msk.f32.mxu0 %vm648_vm1, %v647_v5  ;;  %493 = vmatprep.mubr.msk.f32.mxu1 %vm648_vm1, %v647_v5  ;;  %v277_v11 = vld [vmem:[%s828_s2] sm:$0xf]  ;;  %v649_v13 = vmov 0   ;;  %v650_v20 = vmov 839922192   ;;  %v369_v22 = vlaneseq  ;;  %s186_s10 = scalar_lea.vmem [#allocation5], %s468_s30  ;;  %s389_s20 = scalar_lea.hbm %s829_s3, %s481_s9 }
  0x37   : > { %v193_v3 = vsel %vm191_vm0, %v189_v1, 0.0  ;;  %546 = vset.pattern.permute.xlu0 %v649_v13  ;;  %v367_v21 = vunpack.c.l.s4 %v650_v20  ;;  %s391_s11 = sshll.u32 %s186_s10, 4  ;;  %s377_s22 = scalar_lea.sflag [#allocation4], %s770_s29  ;;  %s392_s11 = int_to_ptr.vmem [resolvable:$true] %s391_s11 }
  0x38   : > { %v194_v4 = vadd.f32 %v193_v3, %v192_v2  ;;  %v370_v24 = vshrl.u32 %v369_v22, 7  ;;  %s580_s26 = scalar_lea.vmem %s392_s11, 128  ;;  %p840_p12 = scmp.ne.s32.totalorder %s834_s24, 0 }
  0x39   : > { %v368_v23 = vunpack.c.0.s8 %v367_v21  ;;  %p581_p11 = scmp.ne.s32.totalorder %s392_s11, %s580_s26  ;;  %s651_s27 = smov [#allocation5]  }
  0x3a   : > { %195 = vadd.xlane.f32.xlu0 %v194_v4  ;;  %s584_s28 = sshll.u32 %s651_s27, 4  ;;  %s585_s28 = int_to_ptr.vmem [resolvable:$false] %s584_s28 }
  0x3b   : > { %v371_v25 = vsub.s32 %v368_v23, %v370_v24  ;;  %p582_p13 = pnand %p581_p11, %p840_p12  ;;  %s586_s16 = scalar_lea.vmem %s585_s28, 256 }
  0x3c   : > { %p587_p3 = scmp.lt.s32.totalorder %s392_s11, %s585_s28  ;;  %p588_p5 = scmp.lt.s32.totalorder %s586_s16, %s580_s26 }
  0x3d   : > { %p583_p1 = pneg %p582_p13 }
  0x3e   : > { %p589_p8 = por %p588_p5, %p587_p3 }
  0x40   : > { %p590_p10 = pnand %p589_p8, %p583_p1 }
  0xc3   : > { %v196_v6 = vpop.xlane.xlu0 %195 }
  0xc4   : > { %v197_v7 = vmul.f32 0.00390625, %v196_v6 }
  0xc6   : > { %487 = vmatpush3.msk.msra.mxu0 %vm191_vm0, %v197_v7 }
  0xc7   : > { %489 = vmatmul.mubr.msk.f32.vlgmr.msra.gmra.mxu0 %vm199_vm2, %v198_v8 }
 0x187   : > { %v272_v9 = vpop.f32.mrf.mxu0 }
 0x188   : > { %v276_v10 = vmax.f32 %v272_v9, 0.0 }
 0x189   : > { %v490_v12 = vpop.f32.mrf.mxu0 }
 0x18a   : > { %492 = vmatpush3.msk.msra.mxu1 %vm282_vm3, %v276_v10 }
 0x18b   : > { %494 = vmatmul.mubr.msk.f32.vlgmr.msra.gmra.mxu1 %vm278_vm4, %v277_v11 }
 0x24b   : > { %v352_v14 = vpop.f32.mrf.mxu1 }
 0x24c   : > { %v474_v15 = vmul.f32 -1.442695, %v352_v14 }
 0x24d   : > { %v495_v16 = vpop.f32.mrf.mxu1 }
 0x24e   : > { %548 = vpow2.f32 %v474_v15 }
 0x25b   : > { %v549_v17 = vpop.eup %548 }
 0x25c   : > { %v359_v18 = vadd.f32 1.0, %v549_v17 }
 0x25e   : > { %550 = vrcp.f32 %v359_v18 }
 0x26b   : > { %v551_v19 = vpop.eup %550 }
 0x26c   : > { %364 = vperm.xlu0 %546, %v551_v19  }
 0x2e7   : > { %v365_v26 = vpop.permute.xlu0 %364 }
 0x2e8   : > { %v372_v27 = vrot.slane %v365_v26, %v371_v25 }
 0x2ea   : > { %v374_v28 = vmul.f32 %v372_v27, %v187_v0 }
 0x2ec   : > { %375 = vst [vmem:[%s186_s10] sm:$0xff] %v374_v28 }
 0x2ed   : > { %593 = shalt.err (!%p590_p10)
}
 0x2ee   : > { %s594_s30 = scalar_lea.hbm %s389_s20, 128  ;;  %s598_s7 = scalar_lea.hbm %s829_s3, 256 }
 0x2ef   : > { %p595_p2 = scmp.ne.s32.totalorder %s389_s20, %s594_s30  ;;  %p599_p7 = scmp.lt.s32.totalorder %s389_s20, %s829_s3 }
 0x2f0   : > { %p600_p0 = scmp.lt.s32.totalorder %s598_s7, %s594_s30 }
 0x2f1   : > { %p596_p4 = pnand %p595_p2, %p840_p12 }
 0x2f2   : > { %p601_p6 = por %p600_p0, %p599_p7 }
 0x2f3   : > { %p597_p9 = pneg %p596_p4 }
 0x2f5   : > { %p602_p11 = pnand %p601_p6, %p597_p9 }
 0x2f7   : > { %605 = shalt.err (!%p602_p11)
}
 0x2f8   : > { %498 = dma.vmem_to_hbm [thread:$0]  (%p840_p12), %s392_s11, 128, %s389_s20, %s377_s22  }
 0x2f9 PF: > { %s403_s6 = sand.u32 1, %s632_s12   ;;  %p841_p13 = scmp.ne.s32.totalorder %s835_s25, 0 }
 0x2fa   : > { %p842_p1 = scmp.ge.s32.totalorder %s644_s15, 2  ;;  %s404_s8 = scalar_lea.sflag [#allocation4], %s403_s6 }
 0x2fc   : > { %p505_p3 = pnand %p842_p1, %p841_p13 }
 0x2fe   : > { %p506_p5 = pneg %p505_p3 }
 0x300   : > { %627 = dma.done.wait (%p506_p5), %s404_s8, 128  }
 0x301   : > { %629 = vsyncadd (%p506_p5), %s404_s8, 4294967168  ;;  %p16_p8 = scmp.ge.s32.totalorder %s697_s18, 4   ;;  %s843_s12 = smov %s636_s13 }
 0x302   : > { %s844_s13 = smov %s640_s14  ;;  %s845_s14 = smov %s709_s21 }
 0x303   : > { %s846_s15 = smov %s697_s18  ;;  %18 = sbr.rel (!%p16_p8) target bundleno = 5 (0x5), region = 77 }
 0x308   :  { %409 = vsyncpa [#allocation3], 1 }
 0x309   :  { %411 = vsyncpa [#allocation3 + $0x1], 1 }
 0x30a   :  { %412 = vsyncpa [#allocation4], 1 }
 0x30b   :  { %414 = vsyncpa [#allocation4 + $0x1], 1 }

</bundles_post_ra>
